<compile_context>
chip_gen: v7x
topology: tpu7x:2x2x1
jax: 0.10.0
libtpu: 0.0.40
codegen_flags: <defaults>
</compile_context>

<pallas_src>
import functools

import jax
import jax.numpy as jnp
from jax.experimental import pallas as pl
from jax.experimental.pallas import tpu as pltpu

IN_DIM = 32          # in_dim / c_dim
HIDDEN = 32          # hidden_size
N_BLOCKS = 2         # n_blocks (two hidden linears per branch, matching default)
OUT_LANES = 128      # lane-dense output head (rgb lanes 0..2, sdf lane 3, rest 0)
MAX_TILE_N = 4096    # rows per grid step

assert IN_DIM == HIDDEN, "block-diagonal packing below assumes in_dim == hidden_size"
_FUSED = 2 * HIDDEN  # 64


def _round_up(x, m):
    return ((x + m - 1) // m) * m


def _choose_tile(n):
    tile = min(MAX_TILE_N, _round_up(max(n, 8), 256))
    # Guarantee >=2 grid steps whenever there is enough work so both of v7x's
    # TensorCores get a share (v5e/v6e have a single TC; harmless there).
    if n > 256:
        tile = min(tile, _round_up((n + 1) // 2, 256))
    return tile


# ----------------------------------------------------------------------------
# Pallas kernel: fused (block-diagonal) SDF+RGB MLP for one tile of points.
#   x_ref   : (TILE_N, 64)  bf16 = [feat | c_feat]
#   w01_ref : (2, 64, 64)   bf16 = [W0_blockdiag, W1_blockdiag]
#   b01_ref : (2, 1, 64)    f32  = [b0|cb0, b1|cb1]
#   wo_ref  : (64, 128)     bf16 = output head (rgb -> lanes 0..2, sdf -> lane 3)
#   bo_ref  : (1, 128)      f32
#   out_ref : (TILE_N, 128) f32  = activated slab (only lanes 0..3 meaningful)
# ----------------------------------------------------------------------------
def decoder_kernel(x_ref, w01_ref, b01_ref, wo_ref, bo_ref, out_ref):
    f32 = jnp.float32
    bf16 = jnp.bfloat16

    h = jnp.dot(x_ref[...], w01_ref[0], preferred_element_type=f32) + b01_ref[0]
    h = jnp.maximum(h, 0.0)
    h = jnp.dot(h.astype(bf16), w01_ref[1], preferred_element_type=f32) + b01_ref[1]
    h = jnp.maximum(h, 0.0)
    z = jnp.dot(h.astype(bf16), wo_ref[...], preferred_element_type=f32) + bo_ref[...]

    # lanes 0..2 -> sigmoid (rgb), lane 3 -> tanh (sdf).  tanh(z) == 2*sigmoid(2z)-1,
    # so one sigmoid evaluation over the full lane-dense slab suffices.
    lane = jax.lax.broadcasted_iota(jnp.int32, z.shape, 1)
    is_rgb = lane < 3
    s = jax.nn.sigmoid(jnp.where(is_rgb, z, 2.0 * z))
    out_ref[...] = jnp.where(is_rgb, s, 2.0 * s - 1.0)


def pack_decoder_params(params):
    """Pack per-branch weights into block-diagonal fused bf16 tensors."""
    f32, bf16 = jnp.float32, jnp.bfloat16
    H, D = HIDDEN, _FUSED

    w0 = jnp.zeros((D, D), f32)
    w0 = w0.at[:IN_DIM, :H].set(params["w0"])
    w0 = w0.at[IN_DIM:, H:].set(params["cw0"])
    w1 = jnp.zeros((D, D), f32)
    w1 = w1.at[:H, :H].set(params["w1"])
    w1 = w1.at[H:, H:].set(params["cw1"])
    w01 = jnp.stack([w0, w1], axis=0).astype(bf16)            # (2, 64, 64) bf16

    b0 = jnp.concatenate([params["b0"], params["cb0"]], axis=-1)   # (1, 64)
    b1 = jnp.concatenate([params["b1"], params["cb1"]], axis=-1)
    b01 = jnp.stack([b0, b1], axis=0)                          # (2, 1, 64) f32

    wo = jnp.zeros((D, OUT_LANES), f32)
    wo = wo.at[H:, 0:3].set(params["cwo"])     # rgb head -> lanes 0..2
    wo = wo.at[:H, 3:4].set(params["wo"])      # sdf head -> lane 3
    wo = wo.astype(bf16)                                        # (64, 128) bf16

    bo = jnp.zeros((1, OUT_LANES), f32)
    bo = bo.at[:, 0:3].set(params["cbo"])
    bo = bo.at[:, 3:4].set(params["bo"])                        # (1, 128) f32
    return w01, b01, wo, bo


def mlp_pallas(x, w01, b01, wo, bo, tile_n):
    """Run the fused SDF/RGB decoder MLP on a padded (n_pad, 64) bf16 feature slab."""
    n_pad = x.shape[0]
    out = pl.pallas_call(
        decoder_kernel,
        out_shape=jax.ShapeDtypeStruct((n_pad, OUT_LANES), jnp.float32),
        grid=(n_pad // tile_n,),
        in_specs=[
            pl.BlockSpec((tile_n, _FUSED), lambda i: (i, 0)),
            pl.BlockSpec(w01.shape, lambda i: (0, 0, 0)),
            pl.BlockSpec(b01.shape, lambda i: (0, 0, 0)),
            pl.BlockSpec(wo.shape, lambda i: (0, 0)),
            pl.BlockSpec(bo.shape, lambda i: (0, 0)),
        ],
        out_specs=pl.BlockSpec((tile_n, OUT_LANES), lambda i: (i, 0)),
        compiler_params=pltpu.CompilerParams(
            # "parallel" lets v7x shard the point axis across its 2 TensorCores.
            dimension_semantics=("parallel",)),
    )(x, w01, b01, wo, bo)
    return out


# ----------------------------------------------------------------------------
# Plane feature sampling (JAX glue — data-dependent gather).
# TODO(synk): `planes_xy(...)` sub-modules / `normalize_3d_coordinate` are not
# defined in the provided source; assumed learned 2D feature planes sampled
# with bilinear interpolation over coordinates normalized to the submap bounds.
# ----------------------------------------------------------------------------
def bilinear_sample(plane, uv):
    """plane: (C, R, R) channels-first; uv: (N, 2) in [0, 1] -> (N, C)."""
    c, rh, rw = plane.shape
    flat = plane.reshape(c, rh * rw).T            # (R*R, C): contiguous row gathers
    x = jnp.clip(uv[:, 0], 0.0, 1.0) * (rw - 1)
    y = jnp.clip(uv[:, 1], 0.0, 1.0) * (rh - 1)
    x0f = jnp.floor(x)
    y0f = jnp.floor(y)
    wx = (x - x0f)[:, None]
    wy = (y - y0f)[:, None]
    x0 = x0f.astype(jnp.int32)
    y0 = y0f.astype(jnp.int32)
    x1 = jnp.minimum(x0 + 1, rw - 1)
    y1 = jnp.minimum(y0 + 1, rh - 1)

    def gather(yy, xx):
        return jnp.take(flat, yy * rw + xx, axis=0)   # (N, C)

    v00, v01 = gather(y0, x0), gather(y0, x1)
    v10, v11 = gather(y1, x0), gather(y1, x1)
    return (v00 * (1 - wx) * (1 - wy) + v01 * wx * (1 - wy)
            + v10 * (1 - wx) * wy + v11 * wx * wy)


def sample_plane_feature(p_nor, plane_xy, plane_xz, plane_yz):
    xy = bilinear_sample(plane_xy, p_nor[..., jnp.array([0, 1])])
    xz = bilinear_sample(plane_xz, p_nor[..., jnp.array([0, 2])])
    yz = bilinear_sample(plane_yz, p_nor[..., jnp.array([1, 2])])
    return xy + xz + yz


def get_feature_from_points(pts, submap_list):
    """Returns the fused [feat | c_feat] array of shape (N, 64) in one pass
    by sampling channel-stacked [planes | c_planes] tables (no concat)."""
    n = pts.shape[0]
    x_all = jnp.zeros((n, 2 * IN_DIM), jnp.float32)
    pre_mask = jnp.zeros((n,), dtype=bool)
    for sm in submap_list:
        bmin, bmax = sm["boundary"][0], sm["boundary"][1]
        inside = jnp.logical_and(jnp.all(pts > bmin[None, :], axis=-1),
                                 jnp.all(pts < bmax[None, :], axis=-1))
        pts_mask = jnp.logical_and(inside, jnp.logical_xor(pre_mask, inside))
        # NOTE: mirrors the reference exactly (`pre_mask = pts_mask`), including
        # its quirk for 3+ overlapping submaps; later submaps overwrite.
        pre_mask = pts_mask
        p_nor = (pts - bmin[None, :]) / (bmax - bmin)[None, :]
        pxy = jnp.concatenate([sm["planes_xy"], sm["c_planes_xy"]], axis=0)
        pxz = jnp.concatenate([sm["planes_xz"], sm["c_planes_xz"]], axis=0)
        pyz = jnp.concatenate([sm["planes_yz"], sm["c_planes_yz"]], axis=0)
        x = sample_plane_feature(p_nor, pxy, pxz, pyz)            # (N, 64)
        x_all = jnp.where(pts_mask[:, None], x, x_all)
    return x_all


# ----------------------------------------------------------------------------
# Full forward
# ----------------------------------------------------------------------------
def decoders_forward(p, submap_list, params):
    p_shape = p.shape
    pts = p.reshape(-1, 3)
    n = pts.shape[0]

    tile_n = _choose_tile(n)
    n_pad = _round_up(n, tile_n)
    if n_pad != n:
        # Pad the points (cheap, N x 3) so the sampled feature slab is already
        # kernel-sized — no separate pad pass over the (N, 64) features.
        pts = jnp.pad(pts, ((0, n_pad - n), (0, 0)))

    x = get_feature_from_points(pts, submap_list).astype(jnp.bfloat16)  # (n_pad, 64)
    w01, b01, wo, bo = pack_decoder_params(params)
    slab = mlp_pallas(x, w01, b01, wo, bo, tile_n)          # (n_pad, 128)
    raw = slab[:n, :4]                                      # [r, g, b, sdf]
    return raw.reshape(*p_shape[:-1], 4)


# Pure-JAX f32 reference of the (unfused) per-branch MLP, for correctness check.
def decoders_forward_ref(p, submap_list, params):
    p_shape = p.shape
    pts = p.reshape(-1, 3)
    x = get_feature_from_points(pts, submap_list)
    feat, c_feat = x[:, :IN_DIM], x[:, IN_DIM:]
    h = jnp.maximum(feat @ params["w0"] + params["b0"], 0.0)
    h = jnp.maximum(h @ params["w1"] + params["b1"], 0.0)
    sdf = jnp.tanh(h @ params["wo"] + params["bo"])
    hc = jnp.maximum(c_feat @ params["cw0"] + params["cb0"], 0.0)
    hc = jnp.maximum(hc @ params["cw1"] + params["cb1"], 0.0)
    rgb = jax.nn.sigmoid(hc @ params["cwo"] + params["cbo"])
    return jnp.concatenate([rgb, sdf], axis=-1).reshape(*p_shape[:-1], 4)


# ----------------------------------------------------------------------------
# Deterministic parameter / submap construction
# ----------------------------------------------------------------------------
def init_params(key):
    def linear(k, fan_in, fan_out):
        kw, kb = jax.random.split(k)
        bound = 1.0 / jnp.sqrt(fan_in)
        w = jax.random.uniform(kw, (fan_in, fan_out), jnp.float32, -bound, bound)
        b = jax.random.uniform(kb, (1, fan_out), jnp.float32, -bound, bound)
        return w, b

    ks = jax.random.split(key, 6)
    w0, b0 = linear(ks[0], IN_DIM, HIDDEN)
    w1, b1 = linear(ks[1], HIDDEN, HIDDEN)
    wo, bo = linear(ks[2], HIDDEN, 1)
    cw0, cb0 = linear(ks[3], IN_DIM, HIDDEN)
    cw1, cb1 = linear(ks[4], HIDDEN, HIDDEN)
    cwo, cbo = linear(ks[5], HIDDEN, 3)
    return dict(w0=w0, b0=b0, w1=w1, b1=b1, wo=wo, bo=bo,
                cw0=cw0, cb0=cb0, cw1=cw1, cb1=cb1, cwo=cwo, cbo=cbo,
                beta=10.0 * jnp.ones((1,), jnp.float32))  # learnable_beta (unused in fwd)


def make_submap(key, bmin, bmax, res=16):
    ks = jax.random.split(key, 6)
    mk = lambda k: 0.1 * jax.random.normal(k, (IN_DIM, res, res), jnp.float32)
    return dict(
        boundary=(jnp.asarray(bmin, jnp.float32), jnp.asarray(bmax, jnp.float32)),
        planes_xy=mk(ks[0]), planes_xz=mk(ks[1]), planes_yz=mk(ks[2]),
        c_planes_xy=mk(ks[3]), c_planes_xz=mk(ks[4]), c_planes_yz=mk(ks[5]),
    )


if __name__ == "__main__":
    key = jax.random.PRNGKey(0)
    k_pts, k_par, k_s0, k_s1 = jax.random.split(key, 4)

    N = 300  # non-multiple of the tile to exercise padding + a 2-step grid
    pts = jax.random.uniform(k_pts, (N, 3), jnp.float32, minval=-1.0, maxval=1.0)

    params = init_params(k_par)
    submap_list = [
        make_submap(k_s0, bmin=[-1.0, -1.0, -1.0], bmax=[0.1, 1.0, 1.0], res=16),
        make_submap(k_s1, bmin=[-0.1, -1.0, -1.0], bmax=[1.0, 1.0, 1.0], res=16),
    ]

    fwd = jax.jit(functools.partial(decoders_forward, submap_list=submap_list, params=params))
    raw = jax.block_until_ready(fwd(pts))

    assert raw.shape == (N, 4), raw.shape
    assert bool(jnp.all(jnp.isfinite(raw)))
    # rgb in (0,1), sdf in (-1,1)
    assert bool(jnp.all((raw[:, :3] >= 0.0) & (raw[:, :3] <= 1.0)))
    assert bool(jnp.all((raw[:, 3] >= -1.0) & (raw[:, 3] <= 1.0)))

    # Check the fused bf16 block-diagonal kernel against the f32 per-branch MLP.
    ref = jax.block_until_ready(
        jax.jit(functools.partial(decoders_forward_ref, submap_list=submap_list,
                                  params=params))(pts))
    assert bool(jnp.all(jnp.abs(raw - ref) < 2e-2)), float(jnp.max(jnp.abs(raw - ref)))

    print("KERNEL_OK")
</pallas_src>

<mosaic_0001>
module attributes {stable_mosaic.version = 11 : i64} {
  func.func @decoder_kernel(%arg0: i32, %arg1: memref<256x64xbf16, #tpu.memory_space<vmem>>, %arg2: memref<2x64x64xbf16, #tpu.memory_space<vmem>>, %arg3: memref<2x1x64xf32, #tpu.memory_space<vmem>>, %arg4: memref<64x128xbf16, #tpu.memory_space<vmem>>, %arg5: memref<1x128xf32, #tpu.memory_space<vmem>>, %arg6: memref<256x128xf32, #tpu.memory_space<vmem>>) attributes {dimension_semantics = [#tpu.dimension_semantics<parallel>], iteration_bounds = array<i64: 2>, scalar_prefetch = 0 : i64, scratch_operands = 0 : i64, tpu.core_type = #tpu.core_type<tc>, window_params = [{transform_indices = @transform_0, window_bounds = array<i64: 256, 64>}, {pipeline_mode = #tpu.pipeline_mode<synchronous>, transform_indices = @transform_1, window_bounds = array<i64: 2, 64, 64>}, {pipeline_mode = #tpu.pipeline_mode<synchronous>, transform_indices = @transform_2, window_bounds = array<i64: 2, 1, 64>}, {pipeline_mode = #tpu.pipeline_mode<synchronous>, transform_indices = @transform_3, window_bounds = array<i64: 64, 128>}, {pipeline_mode = #tpu.pipeline_mode<synchronous>, transform_indices = @transform_4, window_bounds = array<i64: 1, 128>}, {transform_indices = @transform_5, window_bounds = array<i64: 256, 128>}]} {
    %c0 = arith.constant 0 : index
    %c0_0 = arith.constant 0 : index
    %0 = vector.load %arg1[%c0, %c0_0] : memref<256x64xbf16, #tpu.memory_space<vmem>>, vector<256x64xbf16>
    %c0_1 = arith.constant 0 : index
    %c0_2 = arith.constant 0 : index
    %c0_3 = arith.constant 0 : index
    %1 = vector.load %arg2[%c0_1, %c0_2, %c0_3] : memref<2x64x64xbf16, #tpu.memory_space<vmem>>, vector<1x64x64xbf16>
    %2 = vector.shape_cast %1 : vector<1x64x64xbf16> to vector<64x64xbf16>
    %cst = arith.constant dense<0.000000e+00> : vector<256x64xf32>
    %3 = tpu.matmul %0, %2, %cst {dimension_numbers = #tpu.dot_dimension_numbers<[1], [0], [0], [1], [0, 0, 1, 1], [], []>} : vector<256x64xbf16>, vector<64x64xbf16>, vector<256x64xf32> -> vector<256x64xf32>
    %c0_4 = arith.constant 0 : index
    %c0_5 = arith.constant 0 : index
    %c0_6 = arith.constant 0 : index
    %4 = vector.load %arg3[%c0_4, %c0_5, %c0_6] : memref<2x1x64xf32, #tpu.memory_space<vmem>>, vector<1x1x64xf32>
    %5 = vector.shape_cast %4 : vector<1x1x64xf32> to vector<1x64xf32>
    %6 = vector.broadcast %5 : vector<1x64xf32> to vector<256x64xf32>
    %7 = arith.addf %3, %6 : vector<256x64xf32>
    %cst_7 = arith.constant 0.000000e+00 : f32
    %8 = vector.broadcast %cst_7 : f32 to vector<256x64xf32>
    %9 = arith.maximumf %7, %8 : vector<256x64xf32>
    %10 = arith.truncf %9 : vector<256x64xf32> to vector<256x64xbf16>
    %c1 = arith.constant 1 : index
    %c0_8 = arith.constant 0 : index
    %c0_9 = arith.constant 0 : index
    %11 = vector.load %arg2[%c1, %c0_8, %c0_9] : memref<2x64x64xbf16, #tpu.memory_space<vmem>>, vector<1x64x64xbf16>
    %12 = vector.shape_cast %11 : vector<1x64x64xbf16> to vector<64x64xbf16>
    %cst_10 = arith.constant dense<0.000000e+00> : vector<256x64xf32>
    %13 = tpu.matmul %10, %12, %cst_10 {dimension_numbers = #tpu.dot_dimension_numbers<[1], [0], [0], [1], [0, 0, 1, 1], [], []>} : vector<256x64xbf16>, vector<64x64xbf16>, vector<256x64xf32> -> vector<256x64xf32>
    %c1_11 = arith.constant 1 : index
    %c0_12 = arith.constant 0 : index
    %c0_13 = arith.constant 0 : index
    %14 = vector.load %arg3[%c1_11, %c0_12, %c0_13] : memref<2x1x64xf32, #tpu.memory_space<vmem>>, vector<1x1x64xf32>
    %15 = vector.shape_cast %14 : vector<1x1x64xf32> to vector<1x64xf32>
    %16 = vector.broadcast %15 : vector<1x64xf32> to vector<256x64xf32>
    %17 = arith.addf %13, %16 : vector<256x64xf32>
    %cst_14 = arith.constant 0.000000e+00 : f32
    %18 = vector.broadcast %cst_14 : f32 to vector<256x64xf32>
    %19 = arith.maximumf %17, %18 : vector<256x64xf32>
    %20 = arith.truncf %19 : vector<256x64xf32> to vector<256x64xbf16>
    %c0_15 = arith.constant 0 : index
    %c0_16 = arith.constant 0 : index
    %21 = vector.load %arg4[%c0_15, %c0_16] : memref<64x128xbf16, #tpu.memory_space<vmem>>, vector<64x128xbf16>
    %cst_17 = arith.constant dense<0.000000e+00> : vector<256x128xf32>
    %22 = tpu.matmul %20, %21, %cst_17 {dimension_numbers = #tpu.dot_dimension_numbers<[1], [0], [0], [1], [0, 0, 1, 1], [], []>} : vector<256x64xbf16>, vector<64x128xbf16>, vector<256x128xf32> -> vector<256x128xf32>
    %c0_18 = arith.constant 0 : index
    %c0_19 = arith.constant 0 : index
    %23 = vector.load %arg5[%c0_18, %c0_19] : memref<1x128xf32, #tpu.memory_space<vmem>>, vector<1x128xf32>
    %24 = vector.broadcast %23 : vector<1x128xf32> to vector<256x128xf32>
    %25 = arith.addf %22, %24 : vector<256x128xf32>
    %26 = tpu.iota {dimensions = array<i32: 1>} : vector<256x128xi32>
    %c3_i32 = arith.constant 3 : i32
    %27 = vector.broadcast %c3_i32 : i32 to vector<256x128xi32>
    %28 = arith.cmpi slt, %26, %27 : vector<256x128xi32>
    %cst_20 = arith.constant 2.000000e+00 : f32
    %29 = vector.broadcast %cst_20 : f32 to vector<256x128xf32>
    %30 = arith.mulf %29, %25 : vector<256x128xf32>
    %31 = arith.select %28, %25, %30 : vector<256x128xi1>, vector<256x128xf32>
    %32 = arith.negf %31 : vector<256x128xf32>
    %33 = math.exp %32 : vector<256x128xf32>
    %cst_21 = arith.constant 1.000000e+00 : f32
    %34 = vector.broadcast %cst_21 : f32 to vector<256x128xf32>
    %35 = arith.addf %34, %33 : vector<256x128xf32>
    %36 = arith.divf %34, %35 : vector<256x128xf32>
    %cst_22 = arith.constant 2.000000e+00 : f32
    %37 = vector.broadcast %cst_22 : f32 to vector<256x128xf32>
    %38 = arith.mulf %37, %36 : vector<256x128xf32>
    %cst_23 = arith.constant 1.000000e+00 : f32
    %39 = vector.broadcast %cst_23 : f32 to vector<256x128xf32>
    %40 = arith.subf %38, %39 : vector<256x128xf32>
    %41 = arith.select %28, %36, %40 : vector<256x128xi1>, vector<256x128xf32>
    %c0_24 = arith.constant 0 : index
    %c0_25 = arith.constant 0 : index
    %42 = vector.load %arg6[%c0_24, %c0_25] : memref<256x128xf32, #tpu.memory_space<vmem>>, vector<256x128xf32>
    tpu.vector_store %arg6[%c0_24, %c0_25], %41 {strides = array<i32>} : memref<256x128xf32, #tpu.memory_space<vmem>>, vector<256x128xf32>,
    return
  }
  func.func @transform_0(%arg0: i32) -> (i32, i32) {
    %c0_i32 = arith.constant 0 : i32
    %c0_i32_0 = arith.constant 0 : i32
    return %arg0, %c0_i32 : i32, i32
  }
  func.func @transform_1(%arg0: i32) -> (i32, i32, i32) {
    %c0_i32 = arith.constant 0 : i32
    %c0_i32_0 = arith.constant 0 : i32
    %c0_i32_1 = arith.constant 0 : i32
    %c0_i32_2 = arith.constant 0 : i32
    return %c0_i32, %c0_i32_0, %c0_i32_1 : i32, i32, i32
  }
  func.func @transform_2(%arg0: i32) -> (i32, i32, i32) {
    %c0_i32 = arith.constant 0 : i32
    %c0_i32_0 = arith.constant 0 : i32
    %c0_i32_1 = arith.constant 0 : i32
    %c0_i32_2 = arith.constant 0 : i32
    return %c0_i32, %c0_i32_0, %c0_i32_1 : i32, i32, i32
  }
  func.func @transform_3(%arg0: i32) -> (i32, i32) {
    %c0_i32 = arith.constant 0 : i32
    %c0_i32_0 = arith.constant 0 : i32
    %c0_i32_1 = arith.constant 0 : i32
    return %c0_i32, %c0_i32_0 : i32, i32
  }
  func.func @transform_4(%arg0: i32) -> (i32, i32) {
    %c0_i32 = arith.constant 0 : i32
    %c0_i32_0 = arith.constant 0 : i32
    %c0_i32_1 = arith.constant 0 : i32
    return %c0_i32, %c0_i32_0 : i32, i32
  }
  func.func @transform_5(%arg0: i32) -> (i32, i32) {
    %c0_i32 = arith.constant 0 : i32
    %c0_i32_0 = arith.constant 0 : i32
    return %arg0, %c0_i32 : i32, i32
  }
}

</mosaic_0001>

<bundles_post_ra>
// kernel: decoders_forward.1
= control target key start
LH: loop header
LB: loop body
LE: loop exit
PB: predicated region body
PF: predicated region fallthrough
CT: control target
= control target key end

     0   :  { %s2180_s18 = smov 0   ;;  %s2594_s0 = inlined_call_operand.vmem [shape: bf16[512,64], index: 0, kind: input, shape index: {}]   ;;  %s2595_s1 = inlined_call_operand.vmem [shape: bf16[2,64,64], index: 1, kind: input, shape index: {}]   ;;  %s2596_s2 = inlined_call_operand.vmem [shape: f32[2,1,64], index: 2, kind: input, shape index: {}]   ;;  %s2597_s3 = inlined_call_operand.vmem [shape: bf16[64,128], index: 3, kind: input, shape index: {}]   ;;  %s2598_s4 = inlined_call_operand.vmem [shape: f32[1,128], index: 4, kind: input, shape index: {}]   ;;  %s2599_s5 = inlined_call_operand.vmem [shape: f32[512,128], index: 5, kind: output, shape index: {}]  }
   0x1 LB: > { %s1627_s19 = sadd.s32 4294967295, %s2148_s18   ;;  %p1631_p0 = scmp.ge.s32.totalorder %s2148_s18, 1  ;;  %s2148_s18 = sphi %s2180_s18, %s15_s18  }
   0x2   : > { %p188_p1 = scmp.lt.s32.totalorder %s2148_s18, 3 }
   0x4   : > { %p189_p2 = pnand %p1631_p0, %p188_p1 }
   0x5   : > { %v1986_v0 = vld [vmem:[%s2595_s1] sm:$0xff] (!%p189_p2)   ;;  %s1632_s22 = sshll.u32 (!%p189_p2), %s1627_s19, 5  ;;  %v1987_v1 = vld [vmem:[%s2595_s1 + $0x8] sm:$0xff] (!%p189_p2)   ;;  %v1988_v2 = vld [vmem:[%s2595_s1 + $0x10] sm:$0xff] (!%p189_p2)   ;;  %vm380_vm0 = vcmask (!%p189_p2), 523264  }
   0x6   : > { %192 = sbr.rel (%p189_p2) target bundleno = 786 (0x312), region = 40  ;;  %p217_p3 = scmp.lt.s32.totalorder (!%p189_p2), %s1632_s22, 63  ;;  %1850 = vmatprep.subr.bf16.mxu0 (!%p189_p2), %v1986_v0  ;;  %1970 = vmatprep.subr.bf16.mxu1 (!%p189_p2), %v1986_v0  ;;  %v1989_v4 = vld [vmem:[%s2595_s1 + $0x18] sm:$0xff] (!%p189_p2)   ;;  %v2006_v5 = vld [vmem:[%s2595_s1 + $0x20] sm:$0xff] (!%p189_p2)   ;;  %v2007_v9 = vld [vmem:[%s2595_s1 + $0x28] sm:$0xff] (!%p189_p2)  }
   0x7   : > { %1851 = vmatpush3.bf16.msra.mxu0 (!%p189_p2), %v1986_v0  ;;  %1974 = vmatpush3.bf16.msra.mxu1 (!%p189_p2), %v1986_v0  ;;  %v2008_v16 = vld [vmem:[%s2595_s1 + $0x30] sm:$0xff] (!%p189_p2)   ;;  %v2009_v23 = vld [vmem:[%s2595_s1 + $0x38] sm:$0xff] (!%p189_p2)   ;;  %v2010_v24 = vld [vmem:[%s2597_s3] sm:$0xff] (!%p189_p2)  }
   0x8   : > { %1852 = vmatprep.subr.bf16.mxu0 (!%p189_p2), %v1987_v1  ;;  %1971 = vmatprep.subr.bf16.mxu1 (!%p189_p2), %v1987_v1  ;;  %v2011_v25 = vld [vmem:[%s2597_s3 + $0x8] sm:$0xff] (!%p189_p2)   ;;  %v2012_v26 = vld [vmem:[%s2597_s3 + $0x10] sm:$0xff] (!%p189_p2)   ;;  %v2264_v27 = vld [vmem:[%s2596_s2] ss:$0 sm:$0xff] (!%p189_p2) }
   0xb   : > { %1853 = vmatpush3.bf16.msra.mxu0 (!%p189_p2), %v1987_v1  ;;  %1975 = vmatpush3.bf16.msra.mxu1 (!%p189_p2), %v1987_v1 }
   0xc   : > { %1854 = vmatprep.subr.bf16.mxu0 (!%p189_p2), %v1988_v2  ;;  %1972 = vmatprep.subr.bf16.mxu1 (!%p189_p2), %v1988_v2 }
   0xd   : > { %s2601_s22 = smov (!%p217_p3, %s1632_s22), 63 }
   0xe   : > { %s1633_s27 = sshll.u32 %s2601_s22, 2  ;;  %s1635_s7 = sshll.u32 %s2601_s22, 3 }
   0xf   : > { %s2203_s30 = scalar_lea.vmem %s2594_s0, %s1633_s27  ;;  %1855 = vmatpush3.bf16.msra.mxu0 %v1988_v2  ;;  %1976 = vmatpush3.bf16.msra.mxu1 %v1988_v2  ;;  %s2443_s9 = scalar_lea.vmem %s2599_s5, %s1635_s7 }
  0x10   : > { %v1990_v3 = vld [vmem:[%s2203_s30] sm:$0xff]   ;;  %1856 = vmatprep.subr.bf16.mxu0 %v1989_v4  ;;  %1973 = vmatprep.subr.bf16.mxu1 %v1989_v4  ;;  %v1991_v6 = vld [vmem:[%s2203_s30 + $0x8] sm:$0xff]   ;;  %v1992_v7 = vld [vmem:[%s2203_s30 + $0x10] sm:$0xff]  }
  0x11   : > { %1858 = vmatprep.mubr.msk.bf16.mxu0 %vm380_vm0, %v1990_v3  ;;  %v1998_v8 = vld [vmem:[%s2203_s30 + $0x40] sm:$0xff]   ;;  %v1999_v10 = vld [vmem:[%s2203_s30 + $0x48] sm:$0xff]   ;;  %v2000_v11 = vld [vmem:[%s2203_s30 + $0x50] sm:$0xff]  }
  0x12   : > { %1874 = vmatprep.mubr.msk.bf16.mxu1 %vm380_vm0, %v1998_v8  ;;  %v1993_v12 = vld [vmem:[%s2203_s30 + $0x18] sm:$0xff]   ;;  %v1994_v13 = vld [vmem:[%s2203_s30 + $0x20] sm:$0xff]   ;;  %v1995_v17 = vld [vmem:[%s2203_s30 + $0x28] sm:$0xff]  }
  0x13   : > { %1857 = vmatpush3.bf16.msra.mxu0 %v1989_v4  ;;  %1977 = vmatpush3.bf16.msra.mxu1 %v1989_v4  ;;  %v2001_v14 = vld [vmem:[%s2203_s30 + $0x58] sm:$0xff]   ;;  %v2002_v15 = vld [vmem:[%s2203_s30 + $0x60] sm:$0xff]   ;;  %v2003_v18 = vld [vmem:[%s2203_s30 + $0x68] sm:$0xff]  }
  0x14   : > { %1890 = vmatprep.subr.bf16.mxu1 %v2006_v5  ;;  %v1996_v19 = vld [vmem:[%s2203_s30 + $0x30] sm:$0xff]   ;;  %v1997_v21 = vld [vmem:[%s2203_s30 + $0x38] sm:$0xff]   ;;  %1930 = vmatprep.subr.bf16.mxu0 %v2010_v24 }
  0x15   : > { %v2004_v20 = vld [vmem:[%s2203_s30 + $0x70] sm:$0xff]   ;;  %v2005_v22 = vld [vmem:[%s2203_s30 + $0x78] sm:$0xff]  }
  0x16   : > { %1859 = vmatmul.mubr.msk.bf16.vlgmr.msra.gmra.mrb[0].mxu0 %vm380_vm0, %v1991_v6  ;;  %1875 = vmatmul.mubr.msk.bf16.vlgmr.msra.gmra.mrb[0].mxu1 %vm380_vm0, %v1999_v10 }
  0x17   : > { %1862 = vmatprep.mubr.msk.bf16.mxu0 %vm380_vm0, %v1992_v7  ;;  %1878 = vmatprep.mubr.msk.bf16.mxu1 %vm380_vm0, %v2000_v11 }
  0x18   : > { %1891 = vmatpush3.bf16.msra.mxu1 %v2006_v5  ;;  %1931 = vmatpush3.bf16.msra.mxu0 %v2010_v24 }
  0x19   : > { %1892 = vmatprep.subr.bf16.mxu1 %v2007_v9  ;;  %1932 = vmatprep.subr.bf16.mxu0 %v2011_v25 }
  0x1c   : > { %1893 = vmatpush3.bf16.msra.mxu1 %v2007_v9  ;;  %1933 = vmatpush3.bf16.msra.mxu0 %v2011_v25 }
  0x1d   : > { %1894 = vmatprep.subr.bf16.mxu1 %v2008_v16  ;;  %1934 = vmatprep.subr.bf16.mxu0 %v2012_v26 }
  0x1e   : > { %1863 = vmatmul.mubr.msk.bf16.gmra.mrb[4].mxu0 %vm380_vm0, %v1993_v12  ;;  %1879 = vmatmul.mubr.msk.bf16.gmra.mrb[4].mxu1 %vm380_vm0, %v2001_v14 }
  0x1f   : > { %1866 = vmatprep.mubr.msk.bf16.mxu0 %vm380_vm0, %v1994_v13  ;;  %1882 = vmatprep.mubr.msk.bf16.mxu1 %vm380_vm0, %v2002_v15 }
  0x20   : > { %1895 = vmatpush3.bf16.msra.mxu1 %v2008_v16  ;;  %1935 = vmatpush3.bf16.msra.mxu0 %v2012_v26 }
  0x21   : > { %1896 = vmatprep.subr.bf16.mxu1 %v2009_v23 }
  0x24   : > { %1897 = vmatpush3.bf16.msra.mxu1 %v2009_v23 }
  0x26   : > { %1867 = vmatmul.mubr.msk.bf16.gmra.mrb[8].mxu0 %vm380_vm0, %v1995_v17  ;;  %1883 = vmatmul.mubr.msk.bf16.gmra.mrb[8].mxu1 %vm380_vm0, %v2003_v18 }
  0x27   : > { %1870 = vmatprep.mubr.msk.bf16.mxu0 %vm380_vm0, %v1996_v19  ;;  %1886 = vmatprep.mubr.msk.bf16.mxu1 %vm380_vm0, %v2004_v20 }
  0x2e   : > { %1871 = vmatmul.mubr.msk.bf16.gmra.mrb[12].mxu0 %vm380_vm0, %v1997_v21  ;;  %1887 = vmatmul.mubr.msk.bf16.gmra.mrb[12].mxu1 %vm380_vm0, %v2005_v22 }
  0xe9   : > { %v1860_v28 = vpop.f32.mrb[0].mxu0  ;;  %v1876_v29 = vpop.f32.mrb[0].mxu1 }
  0xea   : > { %v472_v30 = vadd.f32 %v1860_v28, %v2264_v27  ;;  %v463_v31 = vpop.f32.mrb[1].mxu0  ;;  %v536_v32 = vadd.f32 %v1876_v29, %v2264_v27  ;;  %v527_v33 = vpop.f32.mrb[1].mxu1 }
  0xeb   : > { %v464_v34 = vadd.f32 %v2264_v27, %v463_v31  ;;  %v1861_v35 = vpop.f32.mrb[2].mxu0  ;;  %v528_v36 = vadd.f32 %v2264_v27, %v527_v33  ;;  %v1877_v37 = vpop.f32.mrb[2].mxu1 }
  0xec   : > { %v475_v38 = vadd.f32 %v1861_v35, %v2264_v27  ;;  %v466_v39 = vpop.f32.mrb[3].mxu0  ;;  %v608_v40 = vmax.f32 %v536_v32, 0.0  ;;  %v539_v41 = vadd.f32 %v1877_v37, %v2264_v27  ;;  %v530_v42 = vpop.f32.mrb[3].mxu1  ;;  %v592_v46 = vmax.f32 %v472_v30, 0.0 }
  0xed   : > { %v467_v43 = vadd.f32 %v2264_v27, %v466_v39  ;;  %v606_v44 = vmax.f32 %v528_v36, 0.0  ;;  %v531_v45 = vadd.f32 %v2264_v27, %v530_v42  ;;  %v590_v49 = vmax.f32 %v464_v34, 0.0 }
  0xee   : > { %v593_v47 = vmax.f32 %v475_v38, 0.0  ;;  %v609_v48 = vmax.f32 %v539_v41, 0.0 }
  0xef   : > { %v591_v50 = vmax.f32 %v467_v43, 0.0  ;;  %v607_v51 = vmax.f32 %v531_v45, 0.0 }
  0xf0   : > { %v623_v52 = vpack.c.bf16 %v593_v47, %v592_v46  ;;  %v2274_v53 = vpack.c.bf16 %v609_v48, %v608_v40 }
  0xf1   : > { %v622_v54 = vpack.c.bf16 %v591_v50, %v590_v49  ;;  %v1864_v55 = vpop.f32.mrb[4].mxu0  ;;  %v2276_v56 = vpack.c.bf16 %v607_v51, %v606_v44  ;;  %v1880_v57 = vpop.f32.mrb[4].mxu1 }
  0xf2   : > { %v488_v58 = vadd.f32 %v1864_v55, %v2264_v27  ;;  %v479_v59 = vpop.f32.mrb[5].mxu0  ;;  %v552_v60 = vadd.f32 %v1880_v57, %v2264_v27  ;;  %v543_v61 = vpop.f32.mrb[5].mxu1 }
  0xf3   : > { %v480_v62 = vadd.f32 %v2264_v27, %v479_v59  ;;  %v1865_v63 = vpop.f32.mrb[6].mxu0  ;;  %1898 = vmatprep.mubr.msk.bf16.mxu1 %vm380_vm0, %v622_v54  ;;  %v544_v0 = vadd.f32 %v2264_v27, %v543_v61  ;;  %v1881_v1 = vpop.f32.mrb[6].mxu1 }
  0xf4   : > { %v491_v2 = vadd.f32 %v1865_v63, %v2264_v27  ;;  %v482_v3 = vpop.f32.mrb[7].mxu0  ;;  %1899 = vmatmul.mubr.msk.bf16.vlgmr.msra.gmra.mrb[16].mxu1 %vm380_vm0, %v623_v52  ;;  %v612_v4 = vmax.f32 %v552_v60, 0.0  ;;  %v555_v5 = vadd.f32 %v1881_v1, %v2264_v27  ;;  %v546_v6 = vpop.f32.mrb[7].mxu1  ;;  %v596_v10 = vmax.f32 %v488_v58, 0.0 }
  0xf5   : > { %v483_v7 = vadd.f32 %v2264_v27, %v482_v3  ;;  %v610_v8 = vmax.f32 %v544_v0, 0.0  ;;  %v547_v9 = vadd.f32 %v2264_v27, %v546_v6  ;;  %v594_v13 = vmax.f32 %v480_v62, 0.0 }
  0xf6   : > { %v597_v11 = vmax.f32 %v491_v2, 0.0  ;;  %v613_v12 = vmax.f32 %v555_v5, 0.0 }
  0xf7   : > { %v595_v14 = vmax.f32 %v483_v7, 0.0  ;;  %v611_v15 = vmax.f32 %v547_v9, 0.0 }
  0xf8   : > { %v625_v16 = vpack.c.bf16 %v597_v11, %v596_v10  ;;  %v2288_v17 = vpack.c.bf16 %v613_v12, %v612_v4 }
  0xf9   : > { %v624_v18 = vpack.c.bf16 %v595_v14, %v594_v13  ;;  %v1868_v19 = vpop.f32.mrb[8].mxu0  ;;  %v2290_v20 = vpack.c.bf16 %v611_v15, %v610_v8  ;;  %v1884_v21 = vpop.f32.mrb[8].mxu1 }
  0xfa   : > { %v504_v22 = vadd.f32 %v1868_v19, %v2264_v27  ;;  %v495_v23 = vpop.f32.mrb[9].mxu0  ;;  %v568_v24 = vadd.f32 %v1884_v21, %v2264_v27  ;;  %v559_v25 = vpop.f32.mrb[9].mxu1 }
  0xfb   : > { %v496_v26 = vadd.f32 %v2264_v27, %v495_v23  ;;  %v1869_v28 = vpop.f32.mrb[10].mxu0  ;;  %1902 = vmatprep.mubr.msk.bf16.mxu1 %vm380_vm0, %v624_v18  ;;  %v560_v29 = vadd.f32 %v2264_v27, %v559_v25  ;;  %v1885_v30 = vpop.f32.mrb[10].mxu1 }
  0xfc   : > { %v507_v31 = vadd.f32 %v1869_v28, %v2264_v27  ;;  %v498_v32 = vpop.f32.mrb[11].mxu0  ;;  %1903 = vmatmul.mubr.msk.bf16.gmra.mrb[20].mxu1 %vm380_vm0, %v625_v16  ;;  %v616_v33 = vmax.f32 %v568_v24, 0.0  ;;  %v571_v34 = vadd.f32 %v1885_v30, %v2264_v27  ;;  %v562_v35 = vpop.f32.mrb[11].mxu1  ;;  %v600_v39 = vmax.f32 %v504_v22, 0.0 }
  0xfd   : > { %v499_v36 = vadd.f32 %v2264_v27, %v498_v32  ;;  %v614_v37 = vmax.f32 %v560_v29, 0.0  ;;  %v563_v38 = vadd.f32 %v2264_v27, %v562_v35  ;;  %v598_v42 = vmax.f32 %v496_v26, 0.0 }
  0xfe   : > { %v601_v40 = vmax.f32 %v507_v31, 0.0  ;;  %v617_v41 = vmax.f32 %v571_v34, 0.0 }
  0xff   : > { %v599_v43 = vmax.f32 %v499_v36, 0.0  ;;  %v615_v44 = vmax.f32 %v563_v38, 0.0 }
 0x100   : > { %v627_v45 = vpack.c.bf16 %v601_v40, %v600_v39  ;;  %v635_v46 = vpack.c.bf16 %v617_v41, %v616_v33 }
 0x101   : > { %v626_v47 = vpack.c.bf16 %v599_v43, %v598_v42  ;;  %v1872_v48 = vpop.f32.mrb[12].mxu0  ;;  %v634_v49 = vpack.c.bf16 %v615_v44, %v614_v37  ;;  %v1888_v50 = vpop.f32.mrb[12].mxu1 }
 0x102   : > { %v520_v51 = vadd.f32 %v1872_v48, %v2264_v27  ;;  %v511_v52 = vpop.f32.mrb[13].mxu0  ;;  %v584_v54 = vadd.f32 %v1888_v50, %v2264_v27  ;;  %v575_v55 = vpop.f32.mrb[13].mxu1 }
 0x103   : > { %v512_v57 = vadd.f32 %v2264_v27, %v511_v52  ;;  %v1873_v58 = vpop.f32.mrb[14].mxu0  ;;  %1906 = vmatprep.mubr.msk.bf16.mxu1 %vm380_vm0, %v626_v47  ;;  %v576_v59 = vadd.f32 %v2264_v27, %v575_v55  ;;  %v1889_v60 = vpop.f32.mrb[14].mxu1 }
 0x104   : > { %v523_v61 = vadd.f32 %v1873_v58, %v2264_v27  ;;  %v514_v62 = vpop.f32.mrb[15].mxu0  ;;  %1907 = vmatmul.mubr.msk.bf16.gmra.mrb[24].mxu1 %vm380_vm0, %v627_v45  ;;  %v620_v63 = vmax.f32 %v584_v54, 0.0  ;;  %v587_v0 = vadd.f32 %v1889_v60, %v2264_v27  ;;  %v578_v1 = vpop.f32.mrb[15].mxu1  ;;  %v604_v5 = vmax.f32 %v520_v51, 0.0 }
 0x105   : > { %v515_v2 = vadd.f32 %v2264_v27, %v514_v62  ;;  %v618_v3 = vmax.f32 %v576_v59, 0.0  ;;  %v579_v4 = vadd.f32 %v2264_v27, %v578_v1  ;;  %v602_v8 = vmax.f32 %v512_v57, 0.0  ;;  %v2013_v27 = vld [vmem:[%s2597_s3 + $0x18] sm:$0xff]  }
 0x106   : > { %v605_v6 = vmax.f32 %v523_v61, 0.0  ;;  %v621_v7 = vmax.f32 %v587_v0, 0.0  ;;  %1936 = vmatprep.subr.bf16.mxu0 %v2013_v27 }
 0x107   : > { %v603_v9 = vmax.f32 %v515_v2, 0.0  ;;  %v619_v10 = vmax.f32 %v579_v4, 0.0  ;;  %1937 = vmatpush3.bf16.msra.mxu0 %v2013_v27 }
 0x108   : > { %v629_v11 = vpack.c.bf16 %v605_v6, %v604_v5  ;;  %v637_v12 = vpack.c.bf16 %v621_v7, %v620_v63 }
 0x109   : > { %v628_v13 = vpack.c.bf16 %v603_v9, %v602_v8  ;;  %v636_v14 = vpack.c.bf16 %v619_v10, %v618_v3 }
 0x10b   : > { %1910 = vmatprep.mubr.msk.bf16.mxu1 %vm380_vm0, %v628_v13 }
 0x10c   : > { %1911 = vmatmul.mubr.msk.bf16.gmra.mrb[28].mxu1 %vm380_vm0, %v629_v11 }
 0x10d   : > { %1914 = vmatprep.mubr.msk.bf16.mxu1 %vm380_vm0, %v2276_v56 }
 0x114   : > { %1915 = vmatmul.mubr.msk.bf16.gmra.mrb[32].mxu1 %vm380_vm0, %v2274_v53  ;;  %v2332_v53 = vld [vmem:[%s2596_s2 + $0x1] ss:$0 sm:$0xff] }
 0x115   : > { %1918 = vmatprep.mubr.msk.bf16.mxu1 %vm380_vm0, %v2290_v20 }
 0x11c   : > { %1919 = vmatmul.mubr.msk.bf16.gmra.mrb[36].mxu1 %vm380_vm0, %v2288_v17 }
 0x11d   : > { %1922 = vmatprep.mubr.msk.bf16.mxu1 %vm380_vm0, %v634_v49 }
 0x124   : > { %1923 = vmatmul.mubr.msk.bf16.gmra.mrb[40].mxu1 %vm380_vm0, %v635_v46 }
 0x125   : > { %1926 = vmatprep.mubr.msk.bf16.mxu1 %vm380_vm0, %v636_v14 }
 0x12c   : > { %1927 = vmatmul.mubr.msk.bf16.gmra.mrb[44].mxu1 %vm380_vm0, %v637_v12 }
 0x1c7   : > { %v1900_v56 = vpop.f32.mrb[16].mxu1 }
 0x1c8   : > { %v770_v15 = vadd.f32 %v1900_v56, %v2332_v53  ;;  %v761_v16 = vpop.f32.mrb[17].mxu1 }
 0x1c9   : > { %v762_v17 = vadd.f32 %v2332_v53, %v761_v16  ;;  %v1901_v18 = vpop.f32.mrb[18].mxu1 }
 0x1ca   : > { %v773_v19 = vadd.f32 %v1901_v18, %v2332_v53  ;;  %v764_v20 = vpop.f32.mrb[19].mxu1  ;;  %v890_v22 = vmax.f32 %v770_v15, 0.0 }
 0x1cb   : > { %v765_v21 = vadd.f32 %v2332_v53, %v764_v20  ;;  %v888_v24 = vmax.f32 %v762_v17, 0.0 }
 0x1cc   : > { %v891_v23 = vmax.f32 %v773_v19, 0.0 }
 0x1cd   : > { %v889_v25 = vmax.f32 %v765_v21, 0.0 }
 0x1ce   : > { %v921_v26 = vpack.c.bf16 %v891_v23, %v890_v22 }
 0x1cf   : > { %v920_v28 = vpack.c.bf16 %v889_v25, %v888_v24  ;;  %v1904_v29 = vpop.f32.mrb[20].mxu1 }
 0x1d0   : > { %v786_v30 = vadd.f32 %v1904_v29, %v2332_v53  ;;  %v777_v31 = vpop.f32.mrb[21].mxu1 }
 0x1d1   : > { %v778_v32 = vadd.f32 %v2332_v53, %v777_v31  ;;  %v1905_v33 = vpop.f32.mrb[22].mxu1  ;;  %1938 = vmatprep.mubr.msk.bf16.mxu0 %vm380_vm0, %v920_v28 }
 0x1d2   : > { %v789_v34 = vadd.f32 %v1905_v33, %v2332_v53  ;;  %v780_v35 = vpop.f32.mrb[23].mxu1  ;;  %1939 = vmatmul.mubr.msk.bf16.vlgmr.msra.gmra.mrb[16].mxu0 %vm380_vm0, %v921_v26  ;;  %v894_v37 = vmax.f32 %v786_v30, 0.0 }
 0x1d3   : > { %v781_v36 = vadd.f32 %v2332_v53, %v780_v35  ;;  %v892_v39 = vmax.f32 %v778_v32, 0.0 }
 0x1d4   : > { %v895_v38 = vmax.f32 %v789_v34, 0.0 }
 0x1d5   : > { %v893_v40 = vmax.f32 %v781_v36, 0.0 }
 0x1d6   : > { %v923_v41 = vpack.c.bf16 %v895_v38, %v894_v37 }
 0x1d7   : > { %v922_v42 = vpack.c.bf16 %v893_v40, %v892_v39  ;;  %v1908_v43 = vpop.f32.mrb[24].mxu1 }
 0x1d8   : > { %v802_v44 = vadd.f32 %v1908_v43, %v2332_v53  ;;  %v793_v45 = vpop.f32.mrb[25].mxu1 }
 0x1d9   : > { %v794_v46 = vadd.f32 %v2332_v53, %v793_v45  ;;  %v1909_v47 = vpop.f32.mrb[26].mxu1  ;;  %1942 = vmatprep.mubr.msk.bf16.mxu0 %vm380_vm0, %v922_v42 }
 0x1da   : > { %v805_v48 = vadd.f32 %v1909_v47, %v2332_v53  ;;  %v796_v49 = vpop.f32.mrb[27].mxu1  ;;  %1943 = vmatmul.mubr.msk.bf16.gmra.mrb[20].mxu0 %vm380_vm0, %v923_v41  ;;  %v898_v51 = vmax.f32 %v802_v44, 0.0 }
 0x1db   : > { %v797_v50 = vadd.f32 %v2332_v53, %v796_v49  ;;  %v896_v54 = vmax.f32 %v794_v46, 0.0 }
 0x1dc   : > { %v899_v52 = vmax.f32 %v805_v48, 0.0 }
 0x1dd   : > { %v897_v55 = vmax.f32 %v797_v50, 0.0 }
 0x1de   : > { %v925_v57 = vpack.c.bf16 %v899_v52, %v898_v51 }
 0x1df   : > { %v924_v58 = vpack.c.bf16 %v897_v55, %v896_v54  ;;  %v1912_v59 = vpop.f32.mrb[28].mxu1 }
 0x1e0   : > { %v818_v60 = vadd.f32 %v1912_v59, %v2332_v53  ;;  %v809_v61 = vpop.f32.mrb[29].mxu1 }
 0x1e1   : > { %v810_v62 = vadd.f32 %v2332_v53, %v809_v61  ;;  %v1913_v63 = vpop.f32.mrb[30].mxu1  ;;  %1946 = vmatprep.mubr.msk.bf16.mxu0 %vm380_vm0, %v924_v58 }
 0x1e2   : > { %v821_v0 = vadd.f32 %v1913_v63, %v2332_v53  ;;  %v812_v1 = vpop.f32.mrb[31].mxu1  ;;  %1947 = vmatmul.mubr.msk.bf16.gmra.mrb[24].mxu0 %vm380_vm0, %v925_v57  ;;  %v902_v3 = vmax.f32 %v818_v60, 0.0 }
 0x1e3   : > { %v813_v2 = vadd.f32 %v2332_v53, %v812_v1  ;;  %v900_v5 = vmax.f32 %v810_v62, 0.0 }
 0x1e4   : > { %v903_v4 = vmax.f32 %v821_v0, 0.0 }
 0x1e5   : > { %v901_v6 = vmax.f32 %v813_v2, 0.0  ;;  %v1184_v2 = vlaneseq }
 0x1e6   : > { %v927_v7 = vpack.c.bf16 %v903_v4, %v902_v3  ;;  %v2385_v3 = vld [vmem:[%s2598_s4] ss:$0 sm:$0xff] }
 0x1e7   : > { %v926_v8 = vpack.c.bf16 %v901_v6, %v900_v5  ;;  %v1916_v9 = vpop.f32.mrb[32].mxu1  ;;  %v2387_v4 = vand.u32 127, %v1184_v2 }
 0x1e8   : > { %v834_v10 = vadd.f32 %v1916_v9, %v2332_v53  ;;  %v825_v11 = vpop.f32.mrb[33].mxu1 }
 0x1e9   : > { %v826_v12 = vadd.f32 %v2332_v53, %v825_v11  ;;  %v1917_v13 = vpop.f32.mrb[34].mxu1  ;;  %1950 = vmatprep.mubr.msk.bf16.mxu0 %vm380_vm0, %v926_v8  ;;  %vm1186_vm1 = vcmp.lt.s32.totalorder %v2387_v4, 3 }
 0x1ea   : > { %v837_v14 = vadd.f32 %v1917_v13, %v2332_v53  ;;  %v828_v27 = vpop.f32.mrb[35].mxu1  ;;  %1951 = vmatmul.mubr.msk.bf16.gmra.mrb[28].mxu0 %vm380_vm0, %v927_v7  ;;  %v906_v15 = vmax.f32 %v834_v10, 0.0 }
 0x1eb   : > { %v829_v56 = vadd.f32 %v2332_v53, %v828_v27  ;;  %v904_v17 = vmax.f32 %v826_v12, 0.0 }
 0x1ec   : > { %v907_v16 = vmax.f32 %v837_v14, 0.0 }
 0x1ed   : > { %v905_v18 = vmax.f32 %v829_v56, 0.0 }
 0x1ee   : > { %v929_v19 = vpack.c.bf16 %v907_v16, %v906_v15 }
 0x1ef   : > { %v928_v20 = vpack.c.bf16 %v905_v18, %v904_v17  ;;  %v1920_v21 = vpop.f32.mrb[36].mxu1 }
 0x1f0   : > { %v850_v22 = vadd.f32 %v1920_v21, %v2332_v53  ;;  %v841_v23 = vpop.f32.mrb[37].mxu1 }
 0x1f1   : > { %v842_v24 = vadd.f32 %v2332_v53, %v841_v23  ;;  %v1921_v25 = vpop.f32.mrb[38].mxu1  ;;  %1954 = vmatprep.mubr.msk.bf16.mxu0 %vm380_vm0, %v928_v20 }
 0x1f2   : > { %v853_v26 = vadd.f32 %v1921_v25, %v2332_v53  ;;  %v844_v28 = vpop.f32.mrb[39].mxu1  ;;  %1955 = vmatmul.mubr.msk.bf16.gmra.mrb[32].mxu0 %vm380_vm0, %v929_v19  ;;  %v910_v30 = vmax.f32 %v850_v22, 0.0 }
 0x1f3   : > { %v845_v29 = vadd.f32 %v2332_v53, %v844_v28  ;;  %v908_v32 = vmax.f32 %v842_v24, 0.0 }
 0x1f4   : > { %v911_v31 = vmax.f32 %v853_v26, 0.0 }
 0x1f5   : > { %v909_v33 = vmax.f32 %v845_v29, 0.0 }
 0x1f6   : > { %v931_v34 = vpack.c.bf16 %v911_v31, %v910_v30 }
 0x1f7   : > { %v930_v35 = vpack.c.bf16 %v909_v33, %v908_v32  ;;  %v1924_v36 = vpop.f32.mrb[40].mxu1 }
 0x1f8   : > { %v866_v37 = vadd.f32 %v1924_v36, %v2332_v53  ;;  %v857_v38 = vpop.f32.mrb[41].mxu1 }
 0x1f9   : > { %v858_v39 = vadd.f32 %v2332_v53, %v857_v38  ;;  %v1925_v40 = vpop.f32.mrb[42].mxu1  ;;  %1958 = vmatprep.mubr.msk.bf16.mxu0 %vm380_vm0, %v930_v35 }
 0x1fa   : > { %v869_v41 = vadd.f32 %v1925_v40, %v2332_v53  ;;  %v860_v42 = vpop.f32.mrb[43].mxu1  ;;  %1959 = vmatmul.mubr.msk.bf16.gmra.mrb[36].mxu0 %vm380_vm0, %v931_v34  ;;  %v914_v44 = vmax.f32 %v866_v37, 0.0 }
 0x1fb   : > { %v861_v43 = vadd.f32 %v2332_v53, %v860_v42  ;;  %v912_v46 = vmax.f32 %v858_v39, 0.0 }
 0x1fc   : > { %v915_v45 = vmax.f32 %v869_v41, 0.0 }
 0x1fd   : > { %v913_v47 = vmax.f32 %v861_v43, 0.0 }
 0x1fe   : > { %v933_v48 = vpack.c.bf16 %v915_v45, %v914_v44 }
 0x1ff   : > { %v932_v49 = vpack.c.bf16 %v913_v47, %v912_v46  ;;  %v1928_v50 = vpop.f32.mrb[44].mxu1 }
 0x200   : > { %v882_v51 = vadd.f32 %v1928_v50, %v2332_v53  ;;  %v873_v52 = vpop.f32.mrb[45].mxu1 }
 0x201   : > { %v874_v54 = vadd.f32 %v2332_v53, %v873_v52  ;;  %v1929_v55 = vpop.f32.mrb[46].mxu1  ;;  %1962 = vmatprep.mubr.msk.bf16.mxu0 %vm380_vm0, %v932_v49 }
 0x202   : > { %v885_v57 = vadd.f32 %v1929_v55, %v2332_v53  ;;  %v876_v58 = vpop.f32.mrb[47].mxu1  ;;  %1963 = vmatmul.mubr.msk.bf16.gmra.mrb[40].mxu0 %vm380_vm0, %v933_v48  ;;  %v918_v60 = vmax.f32 %v882_v51, 0.0 }
 0x203   : > { %v877_v59 = vadd.f32 %v2332_v53, %v876_v58  ;;  %v916_v62 = vmax.f32 %v874_v54, 0.0 }
 0x204   : > { %v919_v61 = vmax.f32 %v885_v57, 0.0 }
 0x205   : > { %v917_v63 = vmax.f32 %v877_v59, 0.0 }
 0x206   : > { %v935_v0 = vpack.c.bf16 %v919_v61, %v918_v60 }
 0x207   : > { %v934_v1 = vpack.c.bf16 %v917_v63, %v916_v62 }
 0x209   : > { %1966 = vmatprep.mubr.msk.bf16.mxu0 %vm380_vm0, %v934_v1 }
 0x20a   : > { %1967 = vmatmul.mubr.msk.bf16.gmra.mrb[44].mxu0 %vm380_vm0, %v935_v0 }
 0x2a5   : > { %v1940_v5 = vpop.f32.mrb[16].mxu0 }
 0x2a6   : > { %v1066_v53 = vadd.f32 %v1940_v5, %v2385_v3  ;;  %v1057_v6 = vpop.f32.mrb[17].mxu0 }
 0x2a7   : > { %v1058_v7 = vadd.f32 %v2385_v3, %v1057_v6  ;;  %v1941_v8 = vpop.f32.mrb[18].mxu0 }
 0x2a8   : > { %v1189_v9 = vmul.f32 2.0, %v1066_v53  ;;  %v1069_v10 = vadd.f32 %v1941_v8, %v2385_v3  ;;  %v1060_v11 = vpop.f32.mrb[19].mxu0 }
 0x2a9   : > { %v1187_v12 = vmul.f32 2.0, %v1058_v7  ;;  %v1061_v13 = vadd.f32 %v2385_v3, %v1060_v11 }
 0x2aa   : > { %v1221_v14 = vsel %vm1186_vm1, %v1066_v53, %v1189_v9  ;;  %v1190_v27 = vmul.f32 2.0, %v1069_v10 }
 0x2ab   : > { %v1726_v56 = vmul.f32 -1.442695, %v1221_v14  ;;  %v1219_v15 = vsel %vm1186_vm1, %v1058_v7, %v1187_v12  ;;  %v1188_v16 = vmul.f32 2.0, %v1061_v13 }
 0x2ac   : > { %v1724_v17 = vmul.f32 -1.442695, %v1219_v15  ;;  %v1222_v18 = vsel %vm1186_vm1, %v1069_v10, %v1190_v27 }
 0x2ad   : > { %2014 = vpow2.f32 %v1726_v56  ;;  %v1727_v19 = vmul.f32 -1.442695, %v1222_v18  ;;  %v1220_v20 = vsel %vm1186_vm1, %v1061_v13, %v1188_v16  ;;  %v1944_v21 = vpop.f32.mrb[20].mxu0 }
 0x2ae   : > { %2016 = vpow2.f32 %v1724_v17  ;;  %v1725_v22 = vmul.f32 -1.442695, %v1220_v20  ;;  %v1082_v23 = vadd.f32 %v1944_v21, %v2385_v3  ;;  %v1073_v24 = vpop.f32.mrb[21].mxu0 }
 0x2af   : > { %2018 = vpow2.f32 %v1727_v19  ;;  %v1074_v25 = vadd.f32 %v2385_v3, %v1073_v24  ;;  %v1945_v26 = vpop.f32.mrb[22].mxu0 }
 0x2b0   : > { %2020 = vpow2.f32 %v1725_v22  ;;  %v1193_v28 = vmul.f32 2.0, %v1082_v23  ;;  %v1085_v29 = vadd.f32 %v1945_v26, %v2385_v3  ;;  %v1076_v30 = vpop.f32.mrb[23].mxu0 }
 0x2b1   : > { %v1191_v31 = vmul.f32 2.0, %v1074_v25  ;;  %v1077_v32 = vadd.f32 %v2385_v3, %v1076_v30 }
 0x2b2   : > { %v1225_v33 = vsel %vm1186_vm1, %v1082_v23, %v1193_v28  ;;  %v1194_v34 = vmul.f32 2.0, %v1085_v29 }
 0x2b3   : > { %v1730_v35 = vmul.f32 -1.442695, %v1225_v33  ;;  %v1223_v36 = vsel %vm1186_vm1, %v1074_v25, %v1191_v31  ;;  %v1192_v37 = vmul.f32 2.0, %v1077_v32 }
 0x2b4   : > { %v1728_v38 = vmul.f32 -1.442695, %v1223_v36  ;;  %v1226_v39 = vsel %vm1186_vm1, %v1085_v29, %v1194_v34 }
 0x2b5   : > { %2022 = vpow2.f32 %v1730_v35  ;;  %v1731_v40 = vmul.f32 -1.442695, %v1226_v39  ;;  %v1224_v41 = vsel %vm1186_vm1, %v1077_v32, %v1192_v37  ;;  %v1948_v42 = vpop.f32.mrb[24].mxu0 }
 0x2b6   : > { %2024 = vpow2.f32 %v1728_v38  ;;  %v1729_v43 = vmul.f32 -1.442695, %v1224_v41  ;;  %v1098_v44 = vadd.f32 %v1948_v42, %v2385_v3  ;;  %v1089_v45 = vpop.f32.mrb[25].mxu0 }
 0x2b7   : > { %v2015_v46 = vpop.eup %2014  ;;  %2026 = vpow2.f32 %v1731_v40  ;;  %v1090_v47 = vadd.f32 %v2385_v3, %v1089_v45  ;;  %v1949_v48 = vpop.f32.mrb[26].mxu0 }
 0x2b8   : > { %v2017_v49 = vpop.eup %2016  ;;  %v1349_v50 = vadd.f32 1.0, %v2015_v46  ;;  %2028 = vpow2.f32 %v1729_v43  ;;  %v1197_v51 = vmul.f32 2.0, %v1098_v44  ;;  %v1101_v52 = vadd.f32 %v1949_v48, %v2385_v3  ;;  %v1092_v54 = vpop.f32.mrb[27].mxu0 }
 0x2b9   : > { %v2019_v55 = vpop.eup %2018  ;;  %v1347_v57 = vadd.f32 1.0, %v2017_v49  ;;  %v1195_v58 = vmul.f32 2.0, %v1090_v47  ;;  %v1093_v59 = vadd.f32 %v2385_v3, %v1092_v54 }
 0x2ba   : > { %v2021_v60 = vpop.eup %2020  ;;  %2030 = vrcp.f32 %v1349_v50  ;;  %v1350_v61 = vadd.f32 1.0, %v2019_v55  ;;  %v1229_v62 = vsel %vm1186_vm1, %v1098_v44, %v1197_v51  ;;  %v1198_v63 = vmul.f32 2.0, %v1101_v52 }
 0x2bb   : > { %2032 = vrcp.f32 %v1347_v57  ;;  %v1348_v0 = vadd.f32 1.0, %v2021_v60  ;;  %v1734_v1 = vmul.f32 -1.442695, %v1229_v62  ;;  %v1227_v2 = vsel %vm1186_vm1, %v1090_v47, %v1195_v58 }
 0x2bc   : > { %2034 = vrcp.f32 %v1350_v61  ;;  %v1732_v5 = vmul.f32 -1.442695, %v1227_v2  ;;  %v1230_v53 = vsel %vm1186_vm1, %v1101_v52, %v1198_v63  ;;  %v1196_v6 = vmul.f32 2.0, %v1093_v59 }
 0x2bd   : > { %2036 = vrcp.f32 %v1348_v0  ;;  %v1735_v7 = vmul.f32 -1.442695, %v1230_v53  ;;  %v1952_v8 = vpop.f32.mrb[28].mxu0 }
 0x2be   : > { %2038 = vpow2.f32 %v1734_v1  ;;  %v1228_v9 = vsel %vm1186_vm1, %v1093_v59, %v1196_v6  ;;  %v1114_v10 = vadd.f32 %v1952_v8, %v2385_v3  ;;  %v1105_v11 = vpop.f32.mrb[29].mxu0 }
 0x2bf   : > { %v2023_v12 = vpop.eup %2022  ;;  %2040 = vpow2.f32 %v1732_v5  ;;  %v1733_v13 = vmul.f32 -1.442695, %v1228_v9  ;;  %v1106_v14 = vadd.f32 %v2385_v3, %v1105_v11  ;;  %v1953_v27 = vpop.f32.mrb[30].mxu0 }
 0x2c0   : > { %v2025_v56 = vpop.eup %2024  ;;  %v1353_v15 = vadd.f32 1.0, %v2023_v12  ;;  %2042 = vpow2.f32 %v1735_v7  ;;  %v1201_v16 = vmul.f32 2.0, %v1114_v10  ;;  %v1117_v17 = vadd.f32 %v1953_v27, %v2385_v3  ;;  %v1108_v18 = vpop.f32.mrb[31].mxu0 }
 0x2c1   : > { %v2027_v19 = vpop.eup %2026  ;;  %v1351_v20 = vadd.f32 1.0, %v2025_v56  ;;  %2044 = vpow2.f32 %v1733_v13  ;;  %v1199_v21 = vmul.f32 2.0, %v1106_v14  ;;  %v1109_v22 = vadd.f32 %v2385_v3, %v1108_v18 }
 0x2c2   : > { %v2029_v23 = vpop.eup %2028  ;;  %2046 = vrcp.f32 %v1353_v15  ;;  %v1354_v24 = vadd.f32 1.0, %v2027_v19  ;;  %v1233_v25 = vsel %vm1186_vm1, %v1114_v10, %v1201_v16  ;;  %v1202_v26 = vmul.f32 2.0, %v1117_v17 }
 0x2c3   : > { %2048 = vrcp.f32 %v1351_v20  ;;  %v1352_v28 = vadd.f32 1.0, %v2029_v23  ;;  %v1738_v29 = vmul.f32 -1.442695, %v1233_v25  ;;  %v1231_v30 = vsel %vm1186_vm1, %v1106_v14, %v1199_v21 }
 0x2c4   : > { %v2031_v31 = vpop.eup %2030  ;;  %2050 = vrcp.f32 %v1354_v24  ;;  %v1736_v32 = vmul.f32 -1.442695, %v1231_v30  ;;  %v1234_v33 = vsel %vm1186_vm1, %v1117_v17, %v1202_v26  ;;  %v1200_v34 = vmul.f32 2.0, %v1109_v22 }
 0x2c5   : > { %v2033_v35 = vpop.eup %2032  ;;  %v1445_v36 = vmul.f32 2.0, %v2031_v31  ;;  %2052 = vrcp.f32 %v1352_v28  ;;  %v1739_v37 = vmul.f32 -1.442695, %v1234_v33  ;;  %v1956_v38 = vpop.f32.mrb[32].mxu0 }
 0x2c6   : > { %v2035_v39 = vpop.eup %2034  ;;  %v1443_v40 = vmul.f32 2.0, %v2033_v35  ;;  %2054 = vpow2.f32 %v1738_v29  ;;  %v1232_v41 = vsel %vm1186_vm1, %v1109_v22, %v1200_v34  ;;  %v1130_v42 = vadd.f32 %v1956_v38, %v2385_v3  ;;  %v1121_v43 = vpop.f32.mrb[33].mxu0 }
 0x2c7   : > { %v2037_v44 = vpop.eup %2036  ;;  %v1758_v45 = vadd.f32 -1.0, %v1445_v36  ;;  %v1446_v46 = vmul.f32 2.0, %v2035_v39  ;;  %2056 = vpow2.f32 %v1736_v32  ;;  %v1737_v47 = vmul.f32 -1.442695, %v1232_v41  ;;  %v1957_v48 = vpop.f32.mrb[34].mxu0 }
 0x2c8   : > { %v2039_v49 = vpop.eup %2038  ;;  %v1756_v50 = vadd.f32 -1.0, %v1443_v40  ;;  %v1444_v51 = vmul.f32 2.0, %v2037_v44  ;;  %2058 = vpow2.f32 %v1739_v37  ;;  %v1205_v52 = vmul.f32 2.0, %v1130_v42  ;;  %v1124_v54 = vpop.f32.mrb[35].mxu0 }
 0x2c9   : > { %v2041_v55 = vpop.eup %2040  ;;  %v1509_v57 = vsel %vm1186_vm1, %v2031_v31, %v1758_v45  ;;  %v1759_v58 = vadd.f32 -1.0, %v1446_v46  ;;  %v1357_v59 = vadd.f32 1.0, %v2039_v49  ;;  %2060 = vpow2.f32 %v1737_v47 }
 0x2ca   : > { %v2043_v60 = vpop.eup %2042  ;;  %1541 = vst [vmem:[%s2443_s9 + $0x10] sm:$0xff] %v1509_v57  ;;  %v1507_v61 = vsel %vm1186_vm1, %v2033_v35, %v1756_v50  ;;  %v1757_v62 = vadd.f32 -1.0, %v1444_v51  ;;  %v1355_v63 = vadd.f32 1.0, %v2041_v55  ;;  %v1237_v0 = vsel %vm1186_vm1, %v1130_v42, %v1205_v52 }
 0x2cb   : > { %v2045_v1 = vpop.eup %2044  ;;  %1539 = vst [vmem:[%s2443_s9] sm:$0xff] %v1507_v61  ;;  %v1510_v2 = vsel %vm1186_vm1, %v2035_v39, %v1759_v58  ;;  %2062 = vrcp.f32 %v1357_v59  ;;  %v1358_v5 = vadd.f32 1.0, %v2043_v60  ;;  %v1742_v53 = vmul.f32 -1.442695, %v1237_v0 }
 0x2cc   : > { %v2047_v6 = vpop.eup %2046  ;;  %1542 = vst [vmem:[%s2443_s9 + $0x18] sm:$0xff] %v1510_v2  ;;  %v1508_v7 = vsel %vm1186_vm1, %v2037_v44, %v1757_v62  ;;  %2064 = vrcp.f32 %v1355_v63  ;;  %v1356_v8 = vadd.f32 1.0, %v2045_v1  ;;  %v1122_v9 = vadd.f32 %v2385_v3, %v1121_v43 }
 0x2cd   : > { %v2049_v10 = vpop.eup %2048  ;;  %1540 = vst [vmem:[%s2443_s9 + $0x8] sm:$0xff] %v1508_v7  ;;  %v1449_v11 = vmul.f32 2.0, %v2047_v6  ;;  %2066 = vrcp.f32 %v1358_v5  ;;  %v1133_v12 = vadd.f32 %v1957_v48, %v2385_v3  ;;  %v1125_v13 = vadd.f32 %v2385_v3, %v1124_v54  ;;  %v1960_v14 = vpop.f32.mrb[36].mxu0 }
 0x2ce   : > { %v2051_v27 = vpop.eup %2050  ;;  %v1447_v56 = vmul.f32 2.0, %v2049_v10  ;;  %2068 = vrcp.f32 %v1356_v8  ;;  %v1203_v15 = vmul.f32 2.0, %v1122_v9  ;;  %v1146_v16 = vadd.f32 %v1960_v14, %v2385_v3  ;;  %v1137_v17 = vpop.f32.mrb[37].mxu0 }
 0x2cf   : > { %v2053_v18 = vpop.eup %2052  ;;  %v1762_v19 = vadd.f32 -1.0, %v1449_v11  ;;  %v1450_v20 = vmul.f32 2.0, %v2051_v27  ;;  %2070 = vpow2.f32 %v1742_v53  ;;  %v1206_v21 = vmul.f32 2.0, %v1133_v12  ;;  %v1961_v22 = vpop.f32.mrb[38].mxu0 }
 0x2d0   : > { %v2055_v23 = vpop.eup %2054  ;;  %v1760_v24 = vadd.f32 -1.0, %v1447_v56  ;;  %v1448_v25 = vmul.f32 2.0, %v2053_v18  ;;  %v1235_v26 = vsel %vm1186_vm1, %v1122_v9, %v1203_v15  ;;  %v1204_v28 = vmul.f32 2.0, %v1125_v13  ;;  %v1140_v29 = vpop.f32.mrb[39].mxu0 }
 0x2d1   : > { %v2057_v30 = vpop.eup %2056  ;;  %v1513_v31 = vsel %vm1186_vm1, %v2047_v6, %v1762_v19  ;;  %v1763_v32 = vadd.f32 -1.0, %v1450_v20  ;;  %v1361_v33 = vadd.f32 1.0, %v2055_v23  ;;  %v1740_v34 = vmul.f32 -1.442695, %v1235_v26 }
 0x2d2   : > { %v2059_v35 = vpop.eup %2058  ;;  %1545 = vst [vmem:[%s2443_s9 + $0x30] sm:$0xff] %v1513_v31  ;;  %v1511_v36 = vsel %vm1186_vm1, %v2049_v10, %v1760_v24  ;;  %v1761_v37 = vadd.f32 -1.0, %v1448_v25  ;;  %v1359_v38 = vadd.f32 1.0, %v2057_v30  ;;  %v1238_v39 = vsel %vm1186_vm1, %v1133_v12, %v1206_v21 }
 0x2d3   : > { %v2061_v40 = vpop.eup %2060  ;;  %1543 = vst [vmem:[%s2443_s9 + $0x20] sm:$0xff] %v1511_v36  ;;  %v1514_v41 = vsel %vm1186_vm1, %v2051_v27, %v1763_v32  ;;  %2072 = vrcp.f32 %v1361_v33  ;;  %v1362_v42 = vadd.f32 1.0, %v2059_v35  ;;  %v1743_v43 = vmul.f32 -1.442695, %v1238_v39 }
 0x2d4   : > { %1546 = vst [vmem:[%s2443_s9 + $0x38] sm:$0xff] %v1514_v41  ;;  %v1512_v44 = vsel %vm1186_vm1, %v2053_v18, %v1761_v37  ;;  %2074 = vrcp.f32 %v1359_v38  ;;  %v1360_v45 = vadd.f32 1.0, %v2061_v40  ;;  %v1236_v46 = vsel %vm1186_vm1, %v1125_v13, %v1204_v28 }
 0x2d5   : > { %v2063_v47 = vpop.eup %2062  ;;  %1544 = vst [vmem:[%s2443_s9 + $0x28] sm:$0xff] %v1512_v44  ;;  %2076 = vrcp.f32 %v1362_v42  ;;  %v1741_v48 = vmul.f32 -1.442695, %v1236_v46  ;;  %v1209_v49 = vmul.f32 2.0, %v1146_v16  ;;  %v1138_v50 = vadd.f32 %v2385_v3, %v1137_v17  ;;  %v1964_v51 = vpop.f32.mrb[40].mxu0 }
 0x2d6   : > { %v2065_v52 = vpop.eup %2064  ;;  %v1453_v54 = vmul.f32 2.0, %v2063_v47  ;;  %2078 = vrcp.f32 %v1360_v45  ;;  %v1149_v55 = vadd.f32 %v1961_v22, %v2385_v3  ;;  %v1141_v57 = vadd.f32 %v2385_v3, %v1140_v29  ;;  %v1153_v58 = vpop.f32.mrb[41].mxu0 }
 0x2d7   : > { %v2067_v59 = vpop.eup %2066  ;;  %v1451_v60 = vmul.f32 2.0, %v2065_v52  ;;  %2080 = vpow2.f32 %v1740_v34  ;;  %v1241_v61 = vsel %vm1186_vm1, %v1146_v16, %v1209_v49  ;;  %v1207_v62 = vmul.f32 2.0, %v1138_v50  ;;  %v1965_v63 = vpop.f32.mrb[42].mxu0 }
 0x2d8   : > { %v2069_v0 = vpop.eup %2068  ;;  %v1766_v1 = vadd.f32 -1.0, %v1453_v54  ;;  %v1454_v2 = vmul.f32 2.0, %v2067_v59  ;;  %2082 = vpow2.f32 %v1743_v43  ;;  %v1746_v5 = vmul.f32 -1.442695, %v1241_v61  ;;  %v2486_v53 = vpop.f32.mrb[43].mxu0 }
 0x2d9   : > { %v2071_v6 = vpop.eup %2070  ;;  %v1764_v7 = vadd.f32 -1.0, %v1451_v60  ;;  %v1452_v8 = vmul.f32 2.0, %v2069_v0  ;;  %2084 = vpow2.f32 %v1741_v48  ;;  %v1239_v9 = vsel %vm1186_vm1, %v1138_v50, %v1207_v62 }
 0x2da   : > { %v1517_v10 = vsel %vm1186_vm1, %v2063_v47, %v1766_v1  ;;  %v1767_v11 = vadd.f32 -1.0, %v1454_v2  ;;  %v1365_v12 = vadd.f32 1.0, %v2071_v6  ;;  %2086 = vpow2.f32 %v1746_v5 }
 0x2db   : > { %1549 = vst [vmem:[%s2443_s9 + $0x50] sm:$0xff] %v1517_v10  ;;  %v1515_v13 = vsel %vm1186_vm1, %v2065_v52, %v1764_v7  ;;  %v1765_v14 = vadd.f32 -1.0, %v1452_v8  ;;  %v1744_v27 = vmul.f32 -1.442695, %v1239_v9  ;;  %v1210_v56 = vmul.f32 2.0, %v1149_v55 }
 0x2dc   : > { %1547 = vst [vmem:[%s2443_s9 + $0x40] sm:$0xff] %v1515_v13  ;;  %v1518_v15 = vsel %vm1186_vm1, %v2067_v59, %v1767_v11  ;;  %2088 = vrcp.f32 %v1365_v12  ;;  %v1208_v16 = vmul.f32 2.0, %v1141_v57  ;;  %v1162_v17 = vadd.f32 %v1964_v51, %v2385_v3 }
 0x2dd   : > { %v2073_v18 = vpop.eup %2072  ;;  %1550 = vst [vmem:[%s2443_s9 + $0x58] sm:$0xff] %v1518_v15  ;;  %v1516_v19 = vsel %vm1186_vm1, %v2069_v0, %v1765_v14  ;;  %2090 = vpow2.f32 %v1744_v27  ;;  %v1242_v20 = vsel %vm1186_vm1, %v1149_v55, %v1210_v56  ;;  %v1154_v21 = vadd.f32 %v2385_v3, %v1153_v58  ;;  %v1968_v22 = vpop.f32.mrb[44].mxu0 }
 0x2de   : > { %v2075_v23 = vpop.eup %2074  ;;  %1548 = vst [vmem:[%s2443_s9 + $0x48] sm:$0xff] %v1516_v19  ;;  %v1457_v24 = vmul.f32 2.0, %v2073_v18  ;;  %v1747_v25 = vmul.f32 -1.442695, %v1242_v20  ;;  %v1240_v26 = vsel %vm1186_vm1, %v1141_v57, %v1208_v16  ;;  %v1213_v28 = vmul.f32 2.0, %v1162_v17  ;;  %v1169_v29 = vpop.f32.mrb[45].mxu0 }
 0x2df   : > { %v2077_v30 = vpop.eup %2076  ;;  %v1455_v31 = vmul.f32 2.0, %v2075_v23  ;;  %v1745_v32 = vmul.f32 -1.442695, %v1240_v26  ;;  %v1211_v33 = vmul.f32 2.0, %v1154_v21  ;;  %v1165_v34 = vadd.f32 %v1965_v63, %v2385_v3  ;;  %v1969_v35 = vpop.f32.mrb[46].mxu0 }
 0x2e0   : > { %v2079_v36 = vpop.eup %2078  ;;  %v1770_v37 = vadd.f32 -1.0, %v1457_v24  ;;  %v1458_v38 = vmul.f32 2.0, %v2077_v30  ;;  %2092 = vpow2.f32 %v1747_v25  ;;  %v1245_v39 = vsel %vm1186_vm1, %v1162_v17, %v1213_v28  ;;  %v1172_v40 = vpop.f32.mrb[47].mxu0 }
 0x2e1   : > { %v2081_v41 = vpop.eup %2080  ;;  %v1768_v42 = vadd.f32 -1.0, %v1455_v31  ;;  %v1456_v43 = vmul.f32 2.0, %v2079_v36  ;;  %2094 = vpow2.f32 %v1745_v32  ;;  %v1750_v44 = vmul.f32 -1.442695, %v1245_v39 }
 0x2e2   : > { %v2083_v45 = vpop.eup %2082  ;;  %v1521_v46 = vsel %vm1186_vm1, %v2073_v18, %v1770_v37  ;;  %v1771_v47 = vadd.f32 -1.0, %v1458_v38  ;;  %v1363_v48 = vadd.f32 1.0, %v2081_v41  ;;  %v1243_v49 = vsel %vm1186_vm1, %v1154_v21, %v1211_v33 }
 0x2e3   : > { %v2085_v50 = vpop.eup %2084  ;;  %1553 = vst [vmem:[%s2443_s9 + $0x70] sm:$0xff] %v1521_v46  ;;  %v1519_v51 = vsel %vm1186_vm1, %v2075_v23, %v1768_v42  ;;  %v1769_v52 = vadd.f32 -1.0, %v1456_v43  ;;  %v1366_v54 = vadd.f32 1.0, %v2083_v45  ;;  %2096 = vpow2.f32 %v1750_v44 }
 0x2e4   : > { %v2087_v55 = vpop.eup %2086  ;;  %1551 = vst [vmem:[%s2443_s9 + $0x60] sm:$0xff] %v1519_v51  ;;  %v1522_v57 = vsel %vm1186_vm1, %v2077_v30, %v1771_v47  ;;  %2098 = vrcp.f32 %v1363_v48  ;;  %v1364_v58 = vadd.f32 1.0, %v2085_v50  ;;  %v1748_v59 = vmul.f32 -1.442695, %v1243_v49 }
 0x2e5   : > { %1554 = vst [vmem:[%s2443_s9 + $0x78] sm:$0xff] %v1522_v57  ;;  %v1520_v60 = vsel %vm1186_vm1, %v2079_v36, %v1769_v52  ;;  %2100 = vrcp.f32 %v1366_v54  ;;  %v1369_v61 = vadd.f32 1.0, %v2087_v55  ;;  %v1214_v62 = vmul.f32 2.0, %v1165_v34 }
 0x2e6   : > { %v2089_v63 = vpop.eup %2088  ;;  %1552 = vst [vmem:[%s2443_s9 + $0x68] sm:$0xff] %v1520_v60  ;;  %2102 = vrcp.f32 %v1364_v58  ;;  %v1157_v0 = vadd.f32 %v2385_v3, %v2486_v53  ;;  %v1178_v1 = vadd.f32 %v1968_v22, %v2385_v3  ;;  %v1170_v2 = vadd.f32 %v2385_v3, %v1169_v29 }
 0x2e7   : > { %v2091_v5 = vpop.eup %2090  ;;  %v1461_v6 = vmul.f32 2.0, %v2089_v63  ;;  %2104 = vrcp.f32 %v1369_v61  ;;  %v1246_v7 = vsel %vm1186_vm1, %v1165_v34, %v1214_v62  ;;  %v1181_v8 = vadd.f32 %v1969_v35, %v2385_v3 }
 0x2e8   : > { %v1367_v9 = vadd.f32 1.0, %v2091_v5  ;;  %2106 = vpow2.f32 %v1748_v59  ;;  %v1751_v10 = vmul.f32 -1.442695, %v1246_v7  ;;  %v1212_v11 = vmul.f32 2.0, %v1157_v0 }
 0x2e9   : > { %v1774_v12 = vadd.f32 -1.0, %v1461_v6  ;;  %v1217_v13 = vmul.f32 2.0, %v1178_v1  ;;  %v1215_v53 = vmul.f32 2.0, %v1170_v2  ;;  %v1218_v14 = vmul.f32 2.0, %v1181_v8 }
 0x2ea   : > { %v2093_v27 = vpop.eup %2092  ;;  %2108 = vrcp.f32 %v1367_v9  ;;  %v1244_v56 = vsel %vm1186_vm1, %v1157_v0, %v1212_v11  ;;  %v1173_v15 = vadd.f32 %v2385_v3, %v1172_v40 }
 0x2eb   : > { %v2095_v16 = vpop.eup %2094  ;;  %v1525_v17 = vsel %vm1186_vm1, %v2089_v63, %v1774_v12  ;;  %v1370_v18 = vadd.f32 1.0, %v2093_v27  ;;  %2110 = vpow2.f32 %v1751_v10  ;;  %v1749_v19 = vmul.f32 -1.442695, %v1244_v56 }
 0x2ec   : > { %1557 = vst [vmem:[%s2443_s9 + $0x90] sm:$0xff] %v1525_v17  ;;  %v1368_v20 = vadd.f32 1.0, %v2095_v16  ;;  %v1249_v21 = vsel %vm1186_vm1, %v1178_v1, %v1217_v13  ;;  %v1247_v22 = vsel %vm1186_vm1, %v1170_v2, %v1215_v53  ;;  %v1250_v23 = vsel %vm1186_vm1, %v1181_v8, %v1218_v14 }
 0x2ed   : > { %v2097_v24 = vpop.eup %2096  ;;  %2112 = vrcp.f32 %v1370_v18  ;;  %v1754_v3 = vmul.f32 -1.442695, %v1249_v21  ;;  %v1752_v28 = vmul.f32 -1.442695, %v1247_v22  ;;  %v1216_v29 = vmul.f32 2.0, %v1173_v15 }
 0x2ee   : > { %v2099_v25 = vpop.eup %2098  ;;  %2114 = vrcp.f32 %v1368_v20  ;;  %v1373_v26 = vadd.f32 1.0, %v2097_v24  ;;  %v1755_v32 = vmul.f32 -1.442695, %v1250_v23 }
 0x2ef   : > { %v2101_v30 = vpop.eup %2100  ;;  %v1459_v31 = vmul.f32 2.0, %v2099_v25  ;;  %2116 = vpow2.f32 %v1749_v19  ;;  %v1248_v35 = vsel %vm1186_vm1, %v1173_v15, %v1216_v29 }
 0x2f0   : > { %v2103_v33 = vpop.eup %2102  ;;  %v1462_v34 = vmul.f32 2.0, %v2101_v30  ;;  %2118 = vrcp.f32 %v1373_v26  ;;  %v1753_v39 = vmul.f32 -1.442695, %v1248_v35 }
 0x2f1   : > { %v2105_v36 = vpop.eup %2104  ;;  %v1772_v37 = vadd.f32 -1.0, %v1459_v31  ;;  %v1460_v38 = vmul.f32 2.0, %v2103_v33  ;;  %2120 = vpow2.f32 %v1754_v3 }
 0x2f2   : > { %v2107_v40 = vpop.eup %2106  ;;  %v1775_v41 = vadd.f32 -1.0, %v1462_v34  ;;  %v1465_v42 = vmul.f32 2.0, %v2105_v36  ;;  %2122 = vpow2.f32 %v1752_v28 }
 0x2f3   : > { %v1523_v43 = vsel %vm1186_vm1, %v2099_v25, %v1772_v37  ;;  %v1773_v44 = vadd.f32 -1.0, %v1460_v38  ;;  %v1371_v45 = vadd.f32 1.0, %v2107_v40  ;;  %2124 = vpow2.f32 %v1755_v32 }
 0x2f4   : > { %v2109_v46 = vpop.eup %2108  ;;  %1555 = vst [vmem:[%s2443_s9 + $0x80] sm:$0xff] %v1523_v43  ;;  %v1526_v47 = vsel %vm1186_vm1, %v2101_v30, %v1775_v41  ;;  %v1778_v48 = vadd.f32 -1.0, %v1465_v42  ;;  %2126 = vpow2.f32 %v1753_v39 }
 0x2f5   : > { %v2111_v49 = vpop.eup %2110  ;;  %1558 = vst [vmem:[%s2443_s9 + $0x98] sm:$0xff] %v1526_v47  ;;  %v1524_v50 = vsel %vm1186_vm1, %v2103_v33, %v1773_v44  ;;  %v1463_v51 = vmul.f32 2.0, %v2109_v46  ;;  %2128 = vrcp.f32 %v1371_v45 }
 0x2f6   : > { %1556 = vst [vmem:[%s2443_s9 + $0x88] sm:$0xff] %v1524_v50  ;;  %v1529_v52 = vsel %vm1186_vm1, %v2105_v36, %v1778_v48  ;;  %v1374_v54 = vadd.f32 1.0, %v2111_v49 }
 0x2f7   : > { %v2113_v55 = vpop.eup %2112  ;;  %1561 = vst [vmem:[%s2443_s9 + $0xb0] sm:$0xff] %v1529_v52  ;;  %v1776_v57 = vadd.f32 -1.0, %v1463_v51 }
 0x2f8   : > { %v2115_v58 = vpop.eup %2114  ;;  %v1466_v59 = vmul.f32 2.0, %v2113_v55  ;;  %2130 = vrcp.f32 %v1374_v54 }
 0x2f9   : > { %v2117_v60 = vpop.eup %2116  ;;  %v1527_v61 = vsel %vm1186_vm1, %v2109_v46, %v1776_v57  ;;  %v1464_v62 = vmul.f32 2.0, %v2115_v58 }
 0x2fa   : > { %v2119_v63 = vpop.eup %2118  ;;  %1559 = vst [vmem:[%s2443_s9 + $0xa0] sm:$0xff] %v1527_v61  ;;  %v1779_v0 = vadd.f32 -1.0, %v1466_v59  ;;  %v1372_v1 = vadd.f32 1.0, %v2117_v60 }
 0x2fb   : > { %v2121_v2 = vpop.eup %2120  ;;  %v1777_v5 = vadd.f32 -1.0, %v1464_v62  ;;  %v1469_v6 = vmul.f32 2.0, %v2119_v63 }
 0x2fc   : > { %v2123_v7 = vpop.eup %2122  ;;  %v1530_v8 = vsel %vm1186_vm1, %v2113_v55, %v1779_v0  ;;  %2132 = vrcp.f32 %v1372_v1  ;;  %v1377_v9 = vadd.f32 1.0, %v2121_v2 }
 0x2fd   : > { %v2125_v10 = vpop.eup %2124  ;;  %1562 = vst [vmem:[%s2443_s9 + $0xb8] sm:$0xff] %v1530_v8  ;;  %v1528_v11 = vsel %vm1186_vm1, %v2115_v58, %v1777_v5  ;;  %v1782_v12 = vadd.f32 -1.0, %v1469_v6  ;;  %v1375_v13 = vadd.f32 1.0, %v2123_v7 }
 0x2fe   : > { %v2127_v53 = vpop.eup %2126  ;;  %1560 = vst [vmem:[%s2443_s9 + $0xa8] sm:$0xff] %v1528_v11  ;;  %2134 = vrcp.f32 %v1377_v9  ;;  %v1378_v14 = vadd.f32 1.0, %v2125_v10 }
 0x2ff   : > { %v2129_v27 = vpop.eup %2128  ;;  %v1533_v56 = vsel %vm1186_vm1, %v2119_v63, %v1782_v12  ;;  %2136 = vrcp.f32 %v1375_v13  ;;  %v1376_v15 = vadd.f32 1.0, %v2127_v53 }
 0x300   : > { %1565 = vst [vmem:[%s2443_s9 + $0xd0] sm:$0xff] %v1533_v56  ;;  %v1467_v16 = vmul.f32 2.0, %v2129_v27  ;;  %2138 = vrcp.f32 %v1378_v14 }
 0x301   : > { %2140 = vrcp.f32 %v1376_v15 }
 0x302   : > { %v2131_v17 = vpop.eup %2130  ;;  %v1780_v18 = vadd.f32 -1.0, %v1467_v16 }
 0x303   : > { %v1470_v19 = vmul.f32 2.0, %v2131_v17 }
 0x304   : > { %v1531_v20 = vsel %vm1186_vm1, %v2129_v27, %v1780_v18 }
 0x305   : > { %1563 = vst [vmem:[%s2443_s9 + $0xc0] sm:$0xff] %v1531_v20  ;;  %v1783_v21 = vadd.f32 -1.0, %v1470_v19 }
 0x306   : > { %v2133_v22 = vpop.eup %2132 }
 0x307   : > { %v1534_v23 = vsel %vm1186_vm1, %v2131_v17, %v1783_v21  ;;  %v1468_v24 = vmul.f32 2.0, %v2133_v22 }
 0x308   : > { %v2135_v3 = vpop.eup %2134  ;;  %1566 = vst [vmem:[%s2443_s9 + $0xd8] sm:$0xff] %v1534_v23 }
 0x309   : > { %v2137_v25 = vpop.eup %2136  ;;  %v1781_v26 = vadd.f32 -1.0, %v1468_v24  ;;  %v1473_v28 = vmul.f32 2.0, %v2135_v3 }
 0x30a   : > { %v2139_v29 = vpop.eup %2138  ;;  %v1471_v30 = vmul.f32 2.0, %v2137_v25 }
 0x30b   : > { %v2141_v31 = vpop.eup %2140  ;;  %v1532_v32 = vsel %vm1186_vm1, %v2133_v22, %v1781_v26  ;;  %v1786_v33 = vadd.f32 -1.0, %v1473_v28  ;;  %v1474_v34 = vmul.f32 2.0, %v2139_v29 }
 0x30c   : > { %1564 = vst [vmem:[%s2443_s9 + $0xc8] sm:$0xff] %v1532_v32  ;;  %v1784_v35 = vadd.f32 -1.0, %v1471_v30  ;;  %v1472_v36 = vmul.f32 2.0, %v2141_v31 }
 0x30d   : > { %v1537_v37 = vsel %vm1186_vm1, %v2135_v3, %v1786_v33  ;;  %v1787_v38 = vadd.f32 -1.0, %v1474_v34 }
 0x30e   : > { %1569 = vst [vmem:[%s2443_s9 + $0xf0] sm:$0xff] %v1537_v37  ;;  %v1535_v39 = vsel %vm1186_vm1, %v2137_v25, %v1784_v35  ;;  %v1785_v40 = vadd.f32 -1.0, %v1472_v36 }
 0x30f   : > { %1567 = vst [vmem:[%s2443_s9 + $0xe0] sm:$0xff] %v1535_v39  ;;  %v1538_v41 = vsel %vm1186_vm1, %v2139_v29, %v1787_v38 }
 0x310   : > { %1570 = vst [vmem:[%s2443_s9 + $0xf8] sm:$0xff] %v1538_v41  ;;  %v1536_v42 = vsel %vm1186_vm1, %v2141_v31, %v1785_v40 }
 0x311   : > { %1568 = vst [vmem:[%s2443_s9 + $0xe8] sm:$0xff] %v1536_v42 }
 0x312 PF: > { %s15_s18 = sadd.s32 1, %s2148_s18  }
 0x313   : > { %p12_p4 = scmp.ge.s32.totalorder %s15_s18, 4  }
 0x315   :  { %14 = sbr.rel (!%p12_p4) target bundleno = 1 (0x1), region = 72 }

</bundles_post_ra>
